<compile_context>
chip_gen: v7x
topology: tpu7x:2x2x1
jax: 0.10.0
libtpu: 0.0.40
codegen_flags: <defaults>
</compile_context>

<pallas_src>
import functools

import jax
import jax.numpy as jnp
from jax import lax
from jax.experimental import pallas as pl
from jax.experimental.pallas import tpu as pltpu


def _conv2d_im2col_kernel(x_ref, w_ref, b_ref, o_ref, *, kh_size, pad, ho_size):
    """One-shot 'same' conv (stride 1) for the whole batch.

    x_ref: (N, H, W*Cin)        unpadded NHWC input, (w, c) flattened on lanes
    w_ref: (KH*W*Cin, Wo*Cout)  packed conv weights (W-boundary zeros baked in)
    b_ref: (1, Wo*Cout)         bias tiled across output width
    o_ref: (N, Ho, Wo*Cout)     lane-dense output (Wo*Cout == 128 here)
    """
    n, _, wc = x_ref.shape
    x = x_ref[...]
    if pad > 0:
        zrow = jnp.zeros((n, pad, wc), dtype=x.dtype)
        x = jnp.concatenate([zrow, x, zrow], axis=1)          # (N, H+2p, W*Cin)

    # Row-im2col: KH row-shifted views concatenated on the lane axis.
    rows = [x[:, kh:kh + ho_size, :] for kh in range(kh_size)]
    lhs = jnp.concatenate(rows, axis=-1)                      # (N, Ho, KH*W*Cin)
    lhs = lhs.reshape(n * ho_size, kh_size * wc)              # (N*Ho, KH*W*Cin)

    acc = jnp.dot(lhs, w_ref[...], preferred_element_type=jnp.float32)
    acc = acc + b_ref[...]                                    # bias on lane-dense layout
    o_ref[...] = acc.reshape(o_ref.shape).astype(o_ref.dtype)


def _pack_conv_weights(weight_oihw, w_in, wo, padding):
    """Pack OIHW conv weights into (KH*W*Cin, Wo*Cout).

    Rows are ordered (kh, wu, ci) to match the kernel's im2col LHS columns;
    cols are ordered (wo, co).  The W-direction zero padding of the input is
    folded in as zero blocks: rhs[(kh, wu, ci), (wo, co)] = W[kh, wu-wo+p, ci, co]
    when 0 <= wu-wo+p < KW, else 0.
    """
    cout, cin, kh, kw = weight_oihw.shape
    w_hwio = jnp.transpose(weight_oihw, (2, 3, 1, 0))          # (KH, KW, Cin, Cout)
    wo_idx = jnp.arange(wo)
    wu_idx = jnp.arange(w_in)
    kw_idx = wu_idx[None, :] - wo_idx[:, None] + padding       # (Wo, W)
    valid = (kw_idx >= 0) & (kw_idx < kw)
    kw_safe = jnp.clip(kw_idx, 0, kw - 1)
    g = w_hwio[:, kw_safe, :, :]                               # (KH, Wo, W, Cin, Cout)
    g = jnp.where(valid[None, :, :, None, None], g, 0.0)
    g = jnp.transpose(g, (0, 2, 3, 1, 4))                      # (KH, W, Cin, Wo, Cout)
    return g.reshape(kh * w_in * cin, wo * cout)


@functools.partial(jax.jit, static_argnames=("padding",))
def conv2d_pallas(x_nchw, weight_oihw, bias, *, padding=1):
    """Conv2d, stride 1, symmetric zero padding, PyTorch semantics.

    x_nchw:      (N, Cin, H, W)      float32
    weight_oihw: (Cout, Cin, KH, KW) float32
    bias:        (Cout,)             float32
    returns:     (N, Cout, Ho, Wo)   float32
    """
    n, cin, h, w = x_nchw.shape
    cout, _, kh, kw = weight_oihw.shape
    ho = h + 2 * padding - kh + 1
    wo = w + 2 * padding - kw + 1
    # TODO(synk): stride is fixed to 1 (matches the Conv2d layer under test).

    # Layout glue (tiny tensors, fused/dispatched once under jit).
    x_flat = jnp.transpose(x_nchw, (0, 2, 3, 1)).reshape(n, h, w * cin)   # (N, H, W*Cin)
    w_packed = _pack_conv_weights(weight_oihw, w, wo, padding)            # (KH*W*Cin, Wo*Cout)
    b_row = jnp.tile(bias, (wo,)).reshape(1, wo * cout)                   # (1, Wo*Cout)

    kernel = functools.partial(
        _conv2d_im2col_kernel, kh_size=kh, pad=padding, ho_size=ho
    )

    out_flat = pl.pallas_call(
        kernel,
        out_shape=jax.ShapeDtypeStruct((n, ho, wo * cout), x_nchw.dtype),
        grid_spec=pltpu.PrefetchScalarGridSpec(
            num_scalar_prefetch=0,
            grid=(1,),  # whole batch in one invocation; working set << VMEM on all gens
            in_specs=[
                pl.BlockSpec((n, h, w * cin), lambda i: (0, 0, 0)),
                pl.BlockSpec((kh * w * cin, wo * cout), lambda i: (0, 0)),
                pl.BlockSpec((1, wo * cout), lambda i: (0, 0)),
            ],
            out_specs=pl.BlockSpec((n, ho, wo * cout), lambda i: (0, 0, 0)),
        ),
        compiler_params=pltpu.CompilerParams(
            dimension_semantics=("arbitrary",),
        ),
    )(x_flat, w_packed, b_row)

    out_nhwc = out_flat.reshape(n, ho, wo, cout)               # free reshape
    return jnp.transpose(out_nhwc, (0, 3, 1, 2))               # NHWC -> NCHW


class LayerTestModelPallas:
    """JAX/Pallas equivalent of LayerTestModel(Conv2d(4, 8, 3, padding=1))."""

    def __init__(self, in_channels=4, out_channels=8, kernel_size=3, padding=1):
        key = jax.random.PRNGKey(0)
        kw_key, kb_key = jax.random.split(key)
        fan_in = in_channels * kernel_size * kernel_size
        bound = 1.0 / jnp.sqrt(fan_in)  # PyTorch default uniform init bound
        self.weight = jax.random.uniform(
            kw_key,
            (out_channels, in_channels, kernel_size, kernel_size),
            dtype=jnp.float32, minval=-bound, maxval=bound,
        )
        self.bias = jax.random.uniform(
            kb_key, (out_channels,), dtype=jnp.float32, minval=-bound, maxval=bound
        )
        self.padding = padding

    def __call__(self, x):
        return conv2d_pallas(x, self.weight, self.bias, padding=self.padding)


def _reference_conv(x, w, b, padding):
    out = lax.conv_general_dilated(
        x, w,
        window_strides=(1, 1),
        padding=[(padding, padding), (padding, padding)],
        dimension_numbers=("NCHW", "OIHW", "NCHW"),
    )
    return out + b.reshape(1, -1, 1, 1)


if __name__ == "__main__":
    key = jax.random.PRNGKey(0)
    x = jax.random.normal(key, (2, 4, 16, 16), dtype=jnp.float32)  # NCHW

    model = LayerTestModelPallas(in_channels=4, out_channels=8,
                                 kernel_size=3, padding=1)

    y = model(x)
    y = jax.block_until_ready(y)

    y_ref = _reference_conv(x, model.weight, model.bias, padding=1)
    assert y.shape == (2, 8, 16, 16), y.shape
    assert jnp.allclose(y, y_ref, atol=1e-4, rtol=1e-4), \
        float(jnp.max(jnp.abs(y - y_ref)))

    print("KERNEL_OK")
</pallas_src>

<mosaic_0001>
module attributes {stable_mosaic.version = 11 : i64} {
  func.func @_conv2d_im2col_kernel(%arg0: i32, %arg1: memref<2x16x64xf32, #tpu.memory_space<vmem>>, %arg2: memref<192x128xf32, #tpu.memory_space<vmem>>, %arg3: memref<1x128xf32, #tpu.memory_space<vmem>>, %arg4: memref<2x16x128xf32, #tpu.memory_space<vmem>>) attributes {dimension_semantics = [#tpu.dimension_semantics<arbitrary>], iteration_bounds = array<i64: 1>, scalar_prefetch = 0 : i64, scratch_operands = 0 : i64, tpu.core_type = #tpu.core_type<tc>, window_params = [{pipeline_mode = #tpu.pipeline_mode<synchronous>, transform_indices = @transform_0, window_bounds = array<i64: 2, 16, 64>}, {pipeline_mode = #tpu.pipeline_mode<synchronous>, transform_indices = @transform_1, window_bounds = array<i64: 192, 128>}, {pipeline_mode = #tpu.pipeline_mode<synchronous>, transform_indices = @transform_2, window_bounds = array<i64: 1, 128>}, {pipeline_mode = #tpu.pipeline_mode<synchronous>, transform_indices = @transform_3, window_bounds = array<i64: 2, 16, 128>}]} {
    %c0 = arith.constant 0 : index
    %c0_0 = arith.constant 0 : index
    %c0_1 = arith.constant 0 : index
    %0 = vector.load %arg1[%c0, %c0_0, %c0_1] : memref<2x16x64xf32, #tpu.memory_space<vmem>>, vector<2x16x64xf32>
    %cst = arith.constant 0.000000e+00 : f32
    %1 = vector.broadcast %cst : f32 to vector<2x1x64xf32>
    %2 = tpu.concatenate %1, %0, %1 in 1 : vector<2x1x64xf32>, vector<2x16x64xf32>, vector<2x1x64xf32> -> vector<2x18x64xf32>
    %3 = vector.extract_strided_slice %2 {offsets = [0, 0, 0], sizes = [2, 16, 64], strides = [1, 1, 1]} : vector<2x18x64xf32> to vector<2x16x64xf32>
    %4 = vector.extract_strided_slice %2 {offsets = [0, 1, 0], sizes = [2, 16, 64], strides = [1, 1, 1]} : vector<2x18x64xf32> to vector<2x16x64xf32>
    %5 = vector.extract_strided_slice %2 {offsets = [0, 2, 0], sizes = [2, 16, 64], strides = [1, 1, 1]} : vector<2x18x64xf32> to vector<2x16x64xf32>
    %6 = tpu.concatenate %3, %4, %5 in 2 : vector<2x16x64xf32>, vector<2x16x64xf32>, vector<2x16x64xf32> -> vector<2x16x192xf32>
    %7 = vector.shape_cast %6 : vector<2x16x192xf32> to vector<32x192xf32>
    %c0_2 = arith.constant 0 : index
    %c0_3 = arith.constant 0 : index
    %8 = vector.load %arg2[%c0_2, %c0_3] : memref<192x128xf32, #tpu.memory_space<vmem>>, vector<192x128xf32>
    %cst_4 = arith.constant dense<0.000000e+00> : vector<32x128xf32>
    %9 = tpu.matmul %7, %8, %cst_4 {dimension_numbers = #tpu.dot_dimension_numbers<[1], [0], [0], [1], [0, 0, 1, 1], [], []>} : vector<32x192xf32>, vector<192x128xf32>, vector<32x128xf32> -> vector<32x128xf32>
    %c0_5 = arith.constant 0 : index
    %c0_6 = arith.constant 0 : index
    %10 = vector.load %arg3[%c0_5, %c0_6] : memref<1x128xf32, #tpu.memory_space<vmem>>, vector<1x128xf32>
    %11 = vector.broadcast %10 : vector<1x128xf32> to vector<32x128xf32>
    %12 = arith.addf %9, %11 : vector<32x128xf32>
    %13 = vector.shape_cast %12 : vector<32x128xf32> to vector<2x16x128xf32>
    %c0_7 = arith.constant 0 : index
    %c0_8 = arith.constant 0 : index
    %c0_9 = arith.constant 0 : index
    %14 = vector.load %arg4[%c0_7, %c0_8, %c0_9] : memref<2x16x128xf32, #tpu.memory_space<vmem>>, vector<2x16x128xf32>
    tpu.vector_store %arg4[%c0_7, %c0_8, %c0_9], %13 {strides = array<i32>} : memref<2x16x128xf32, #tpu.memory_space<vmem>>, vector<2x16x128xf32>,
    return
  }
  func.func @transform_0(%arg0: i32) -> (i32, i32, i32) {
    %c0_i32 = arith.constant 0 : i32
    %c0_i32_0 = arith.constant 0 : i32
    %c0_i32_1 = arith.constant 0 : i32
    %c0_i32_2 = arith.constant 0 : i32
    return %c0_i32, %c0_i32_0, %c0_i32_1 : i32, i32, i32
  }
  func.func @transform_1(%arg0: i32) -> (i32, i32) {
    %c0_i32 = arith.constant 0 : i32
    %c0_i32_0 = arith.constant 0 : i32
    %c0_i32_1 = arith.constant 0 : i32
    return %c0_i32, %c0_i32_0 : i32, i32
  }
  func.func @transform_2(%arg0: i32) -> (i32, i32) {
    %c0_i32 = arith.constant 0 : i32
    %c0_i32_0 = arith.constant 0 : i32
    %c0_i32_1 = arith.constant 0 : i32
    return %c0_i32, %c0_i32_0 : i32, i32
  }
  func.func @transform_3(%arg0: i32) -> (i32, i32, i32) {
    %c0_i32 = arith.constant 0 : i32
    %c0_i32_0 = arith.constant 0 : i32
    %c0_i32_1 = arith.constant 0 : i32
    %c0_i32_2 = arith.constant 0 : i32
    return %c0_i32, %c0_i32_0, %c0_i32_1 : i32, i32, i32
  }
}

</mosaic_0001>

<bundles_post_ra>
// kernel: tile.8
= control target key start
LH: loop header
LB: loop body
LE: loop exit
PB: predicated region body
PF: predicated region fallthrough
CT: control target
= control target key end

     0   :  { %s28_s0 = inlined_call_operand.vmem [shape: f32[8], index: 0, kind: input, shape index: {}]   ;;  %s29_s1 = inlined_call_operand.vmem [shape: f32[16,8], index: 1, kind: output, shape index: {}]  }
   0x1   :  { %v4_v0 = vld [vmem:[%s28_s0] ss:$0 sm:$0xff] }
   0x2   :  { %5 = vst [vmem:[%s29_s1] sm:$0xff] %v4_v0  ;;  %8 = vst [vmem:[%s29_s1 + $0x8] sm:$0xff] %v4_v0 }

// kernel: tile.9
= control target key start
LH: loop header
LB: loop body
LE: loop exit
PB: predicated region body
PF: predicated region fallthrough
CT: control target
= control target key end

     0   :  { %s131_s10 = smov 120   ;;  %s132_s11 = smov 104   ;;  %vm3_vm0 = vcmask 64512   ;;  %vm9_vm1 = vcmask 1048512   ;;  %vm15_vm2 = vcmask 982912   ;;  %vm21_vm3 = vcmask 917312   ;;  %s207_s0 = inlined_call_operand.vmem [shape: f32[16,8], index: 0, kind: input, shape index: {}]   ;;  %s208_s1 = inlined_call_operand.vmem [shape: f32[1,128], index: 1, kind: output, shape index: {}]  }
   0x1   :  { %v101_v0 = vld [vmem:[%s207_s0 + $0xf] sm:$0x1]   ;;  %v103_v1 = vld [vmem:[%s207_s0 + $0xd] sm:$0x1]   ;;  %v102_v2 = vld [vmem:[%s207_s0 + $0xe] sm:$0x1]  }
   0x2   :  { %7 = vrot.lane.b32.xlu0 %v101_v0, %s131_s10  ;;  %19 = vrot.lane.b32.xlu1 %v103_v1, %s132_s11  ;;  %v104_v3 = vld [vmem:[%s207_s0 + $0xc] sm:$0x1]   ;;  %s133_s16 = smov 112   ;;  %s134_s17 = smov 96   ;;  %v105_v4 = vld [vmem:[%s207_s0 + $0xb] sm:$0x1]  }
   0x3   :  { %v106_v5 = vld [vmem:[%s207_s0 + $0xa] sm:$0x1]   ;;  %v2_v6 = vld [vmem:[%s207_s0] sm:$0x1]   ;;  %s135_s24 = smov 88   ;;  %s136_s25 = smov 80  }
   0x4   :  { %4 = vst.msk [vmem:[#allocation0] sm:$0x1] %vm3_vm0, %v2_v6   ;;  %v107_v7 = vld [vmem:[%s207_s0 + $0x9] sm:$0x1]   ;;  %v108_v8 = vld [vmem:[%s207_s0 + $0x8] sm:$0x1]  }
   0x5   :  { %s137_s30 = smov 72   ;;  %s138_s2 = smov 64   ;;  %v109_v9 = vld [vmem:[%s207_s0 + $0x7] sm:$0x1]   ;;  %v110_v10 = vld [vmem:[%s207_s0 + $0x6] sm:$0x1]  }
   0x6   :  { %13 = vrot.lane.b32.xlu0 %v102_v2, %s133_s16  ;;  %25 = vrot.lane.b32.xlu1 %v104_v3, %s134_s17  ;;  %s139_s7 = smov 56   ;;  %s140_s8 = smov 48   ;;  %v111_v11 = vld [vmem:[%s207_s0 + $0x5] sm:$0x1]   ;;  %v112_v12 = vld [vmem:[%s207_s0 + $0x4] sm:$0x1]  }
   0x7   :  { %s141_s13 = smov 40   ;;  %s142_s14 = smov 32   ;;  %v113_v13 = vld [vmem:[%s207_s0 + $0x3] sm:$0x1]   ;;  %v114_v14 = vld [vmem:[%s207_s0 + $0x2] sm:$0x1]  }
   0x8   :  { %s143_s19 = smov 24   ;;  %s144_s20 = smov 16   ;;  %v115_v15 = vld [vmem:[%s207_s0 + $0x1] sm:$0x1]   ;;  %vm27_vm4 = vcmask 851712   ;;  %vm33_vm5 = vcmask 786112  }
   0x9   :  { %s145_s0 = smov 8   ;;  %vm39_vm6 = vcmask 720512   ;;  %vm45_vm7 = vcmask 654912   ;;  %vm51_vm8 = vcmask 589312   ;;  %vm57_vm9 = vcmask 523712  }
   0xa   :  { %31 = vrot.lane.b32.xlu0 %v105_v4, %s135_s24  ;;  %37 = vrot.lane.b32.xlu1 %v106_v5, %s136_s25  ;;  %vm63_vm10 = vcmask 458112   ;;  %vm69_vm11 = vcmask 392512   ;;  %vm75_vm12 = vcmask 326912   ;;  %vm81_vm13 = vcmask 261312  }
   0xb   :  { %vm87_vm14 = vcmask 195712   ;;  %vm93_vm15 = vcmask 130112  }
   0xe   :  { %43 = vrot.lane.b32.xlu0 %v107_v7, %s137_s30  ;;  %49 = vrot.lane.b32.xlu1 %v108_v8, %s138_s2 }
  0x12   :  { %55 = vrot.lane.b32.xlu0 %v109_v9, %s139_s7  ;;  %61 = vrot.lane.b32.xlu1 %v110_v10, %s140_s8 }
  0x16   :  { %67 = vrot.lane.b32.xlu0 %v111_v11, %s141_s13  ;;  %73 = vrot.lane.b32.xlu1 %v112_v12, %s142_s14 }
  0x1a   :  { %79 = vrot.lane.b32.xlu0 %v113_v13, %s143_s19  ;;  %85 = vrot.lane.b32.xlu1 %v114_v14, %s144_s20 }
  0x1e   :  { %91 = vrot.lane.b32.xlu0 %v115_v15, %s145_s0 }
  0x74   :  { %v8_v16 = vpop.permute.xlu0 %7   ;;  %v20_v17 = vpop.permute.xlu1 %19  }
  0x75   :  { %10 = vst.msk [vmem:[#allocation0] sm:$0x1] %vm9_vm1, %v8_v16  }
  0x78   :  { %v14_v18 = vpop.permute.xlu0 %13   ;;  %v26_v19 = vpop.permute.xlu1 %25  }
  0x79   :  { %16 = vst.msk [vmem:[#allocation0] sm:$0x1] %vm15_vm2, %v14_v18  }
  0x7a   :  { %22 = vst.msk [vmem:[#allocation0] sm:$0x1] %vm21_vm3, %v20_v17  }
  0x7b   :  { %28 = vst.msk [vmem:[#allocation0] sm:$0x1] %vm27_vm4, %v26_v19  }
  0x7c   :  { %v32_v20 = vpop.permute.xlu0 %31   ;;  %v38_v21 = vpop.permute.xlu1 %37  }
  0x7d   :  { %34 = vst.msk [vmem:[#allocation0] sm:$0x1] %vm33_vm5, %v32_v20  }
  0x7e   :  { %40 = vst.msk [vmem:[#allocation0] sm:$0x1] %vm39_vm6, %v38_v21  }
  0x80   :  { %v44_v22 = vpop.permute.xlu0 %43   ;;  %v50_v23 = vpop.permute.xlu1 %49  }
  0x81   :  { %46 = vst.msk [vmem:[#allocation0] sm:$0x1] %vm45_vm7, %v44_v22  }
  0x82   :  { %52 = vst.msk [vmem:[#allocation0] sm:$0x1] %vm51_vm8, %v50_v23  }
  0x84   :  { %v56_v24 = vpop.permute.xlu0 %55   ;;  %v62_v25 = vpop.permute.xlu1 %61  }
  0x85   :  { %58 = vst.msk [vmem:[#allocation0] sm:$0x1] %vm57_vm9, %v56_v24  }
  0x86   :  { %64 = vst.msk [vmem:[#allocation0] sm:$0x1] %vm63_vm10, %v62_v25  }
  0x88   :  { %v68_v26 = vpop.permute.xlu0 %67   ;;  %v74_v27 = vpop.permute.xlu1 %73  }
  0x89   :  { %70 = vst.msk [vmem:[#allocation0] sm:$0x1] %vm69_vm11, %v68_v26  }
  0x8a   :  { %76 = vst.msk [vmem:[#allocation0] sm:$0x1] %vm75_vm12, %v74_v27  }
  0x8c   :  { %v80_v28 = vpop.permute.xlu0 %79   ;;  %v86_v29 = vpop.permute.xlu1 %85  }
  0x8d   :  { %82 = vst.msk [vmem:[#allocation0] sm:$0x1] %vm81_vm13, %v80_v28  }
  0x8e   :  { %88 = vst.msk [vmem:[#allocation0] sm:$0x1] %vm87_vm14, %v86_v29  }
  0x90   :  { %v92_v30 = vpop.permute.xlu0 %91  }
  0x91   :  { %94 = vst.msk [vmem:[#allocation0] sm:$0x1] %vm93_vm15, %v92_v30  }
  0x98   :  { %v98_v31 = vld [vmem:[#allocation0] sm:$0x1] }
  0x99   :  { %100 = vst [vmem:[%s208_s1] sm:$0x1] %v98_v31 }

// kernel: conv2d_pallas.1
= control target key start
LH: loop header
LB: loop body
LE: loop exit
PB: predicated region body
PF: predicated region fallthrough
CT: control target
= control target key end

     0   :  { %vm22_vm0 = vcmask 1040384   ;;  %v291_v3 = vmov 0.0|0.0   ;;  %vm43_vm1 = vcmask 1046528   ;;  %vm66_vm2 = vcmask 1045504   ;;  %s292_s8 = smov 64   ;;  %s484_s0 = inlined_call_operand.vmem [shape: f32[2,16,64], index: 0, kind: input, shape index: {}]   ;;  %s485_s1 = inlined_call_operand.vmem [shape: f32[192,128], index: 1, kind: input, shape index: {}]   ;;  %s486_s2 = inlined_call_operand.vmem [shape: f32[1,128], index: 2, kind: input, shape index: {}]   ;;  %s487_s3 = inlined_call_operand.vmem [shape: f32[2,16,128], index: 3, kind: output, shape index: {}]  }
   0x1   :  { %v14_v0 = vld [vmem:[%s484_s0] sm:$0xff]  ;;  %v15_v1 = vld [vmem:[%s484_s0 + $0x8] sm:$0xff]  ;;  %v16_v2 = vld [vmem:[%s484_s0 + $0x10] sm:$0xff]  ;;  %219 = vmatprep.subr.bf16.mxu0 %v291_v3  ;;  %255 = vmatprep.subr.bf16.mxu1 %v291_v3  ;;  %vm77_vm3 = vcmask 523264  }
   0x2   :  { %v17_v4 = vld [vmem:[%s484_s0 + $0x18] sm:$0xff]  ;;  %v23_v5 = vrot.slane %v14_v0, 7  ;;  %v24_v6 = vrot.slane %v15_v1, 7  ;;  %v26_v7 = vrot.slane %v16_v2, 7  ;;  %v82_v8 = vld [vmem:[%s485_s1] sm:$0xff]  ;;  %v83_v9 = vld [vmem:[%s485_s1 + $0x8] sm:$0xff] }
   0x3   :  { %v27_v10 = vrot.slane %v17_v4, 7  ;;  %v220_v11 = vpack.c.bf16 %v83_v9, %v82_v8  ;;  %v84_v12 = vld [vmem:[%s485_s1 + $0x10] sm:$0xff]  ;;  %v85_v13 = vld [vmem:[%s485_s1 + $0x18] sm:$0xff]  ;;  %v86_v26 = vld [vmem:[%s485_s1 + $0x20] sm:$0xff] }
   0x4   :  { %v340_v14 = vsel %vm22_vm0, %v23_v5, %v24_v6  ;;  %v343_v15 = vsel %vm22_vm0, 0.0, %v23_v5  ;;  %v346_v16 = vsel %vm22_vm0, 0.0, %v26_v7  ;;  %v37_v17 = vsel %vm22_vm0, %v24_v6, 0.0  ;;  %v87_v27 = vld [vmem:[%s485_s1 + $0x28] sm:$0xff]  ;;  %v88_v36 = vld [vmem:[%s485_s1 + $0x30] sm:$0xff]  ;;  %v89_v37 = vld [vmem:[%s485_s1 + $0x38] sm:$0xff] }
   0x5   :  { %v350_v18 = vsel %vm22_vm0, %v26_v7, %v27_v10  ;;  %v44_v19 = vrot.slane %v343_v15, 1  ;;  %v45_v20 = vrot.slane %v340_v14, 1  ;;  %v49_v21 = vrot.slane %v346_v16, 1  ;;  %221 = vmatpush1.bf16.msra.mxu0 %v220_v11  ;;  %267 = vmatpush1.bf16.msra.mxu1 %v220_v11  ;;  %v90_v46 = vld [vmem:[%s485_s1 + $0x40] sm:$0xff]  ;;  %v91_v47 = vld [vmem:[%s485_s1 + $0x48] sm:$0xff]  ;;  %v92_v52 = vld [vmem:[%s485_s1 + $0x50] sm:$0xff] }
   0x6   :  { %v50_v22 = vrot.slane %v350_v18, 1  ;;  %v38_v23 = vsel %vm22_vm0, %v27_v10, 0.0  ;;  %v47_v24 = vrot.slane %v37_v17, 1  ;;  %222 = vmatprep.subr.bf16.mxu0 %v291_v3  ;;  %256 = vmatprep.subr.bf16.mxu1 %v291_v3  ;;  %v223_v25 = vpack.c.bf16 %v85_v13, %v84_v12  ;;  %v93_v53 = vld [vmem:[%s485_s1 + $0x58] sm:$0xff]  ;;  %v94_v55 = vld [vmem:[%s485_s1 + $0x60] sm:$0xff]  ;;  %v95_v56 = vld [vmem:[%s485_s1 + $0x68] sm:$0xff] }
   0x7   :  { %v46_v28 = vsel %vm43_vm1, %v44_v19, %v45_v20  ;;  %v52_v29 = vrot.slane %v38_v23, 1  ;;  %v226_v34 = vpack.c.bf16 %v87_v27, %v86_v26  ;;  %v67_v35 = vrot.slane %v343_v15, 2  ;;  %v96_v58 = vld [vmem:[%s485_s1 + $0x70] sm:$0xff]  ;;  %v97_v59 = vld [vmem:[%s485_s1 + $0x78] sm:$0xff]  ;;  %v98_v61 = vld [vmem:[%s485_s1 + $0x80] sm:$0xff] }
   0x8   :  { %v51_v30 = vsel %vm43_vm1, %v49_v21, %v50_v22  ;;  %v48_v31 = vsel %vm43_vm1, %v45_v20, %v47_v24  ;;  %v68_v38 = vrot.slane %v340_v14, 2  ;;  %v72_v40 = vrot.slane %v346_v16, 2  ;;  %v99_v62 = vld [vmem:[%s485_s1 + $0x88] sm:$0xff]  ;;  %v100_v0 = vld [vmem:[%s485_s1 + $0x90] sm:$0xff]  ;;  %v101_v1 = vld [vmem:[%s485_s1 + $0x98] sm:$0xff] }
   0x9   :  { %v281_v32 = vpack.i.bf16 %v51_v30, %v46_v28  ;;  %v53_v33 = vsel %vm43_vm1, %v50_v22, %v52_v29  ;;  %224 = vmatpush1.bf16.msra.mxu0 %v223_v25  ;;  %268 = vmatpush1.bf16.msra.mxu1 %v223_v25  ;;  %v73_v42 = vrot.slane %v350_v18, 2  ;;  %v70_v43 = vrot.slane %v37_v17, 2  ;;  %v102_v4 = vld [vmem:[%s485_s1 + $0xa0] sm:$0xff]  ;;  %v103_v5 = vld [vmem:[%s485_s1 + $0xa8] sm:$0xff]  ;;  %v104_v7 = vld [vmem:[%s485_s1 + $0xb0] sm:$0xff] }
   0xa   :  { %225 = vmatprep.subr.bf16.mxu0 %v291_v3  ;;  %257 = vmatprep.subr.bf16.mxu1 %v291_v3  ;;  %v286_v39 = vpack.i.bf16 %v53_v33, %v48_v31  ;;  %v69_v41 = vsel %vm66_vm2, %v67_v35, %v68_v38  ;;  %v75_v44 = vrot.slane %v38_v23, 2  ;;  %v229_v45 = vpack.c.bf16 %v89_v37, %v88_v36  ;;  %v105_v8 = vld [vmem:[%s485_s1 + $0xb8] sm:$0xff] }
   0xb   :  { %282 = vrot.lane.b32.xlu0 %v281_v32, %s292_s8  ;;  %v74_v48 = vsel %vm66_vm2, %v72_v40, %v73_v42  ;;  %v392_v49 = vsel %vm66_vm2, %v68_v38, %v70_v43  ;;  %215 = vmatprep.mubr.msk.f32.mxu0 %vm77_vm3, %v69_v41  ;;  %v232_v51 = vpack.c.bf16 %v91_v47, %v90_v46 }
   0xc   :  { %v395_v50 = vsel %vm66_vm2, %v73_v42, %v75_v44  ;;  %217 = vmatprep.mubr.msk.f32.mxu1 %vm77_vm3, %v74_v48  ;;  %v235_v54 = vpack.c.bf16 %v93_v53, %v92_v52  ;;  %v238_v57 = vpack.c.bf16 %v95_v56, %v94_v55  ;;  %v241_v60 = vpack.c.bf16 %v97_v59, %v96_v58 }
   0xd   :  { %227 = vmatpush1.bf16.msra.mxu0 %v226_v34  ;;  %269 = vmatpush1.bf16.msra.mxu1 %v226_v34  ;;  %v244_v63 = vpack.c.bf16 %v99_v62, %v98_v61  ;;  %v247_v2 = vpack.c.bf16 %v101_v1, %v100_v0  ;;  %v250_v6 = vpack.c.bf16 %v103_v5, %v102_v4 }
   0xe   :  { %228 = vmatprep.subr.bf16.mxu0 %v291_v3  ;;  %258 = vmatprep.subr.bf16.mxu1 %v291_v3  ;;  %v253_v9 = vpack.c.bf16 %v105_v8, %v104_v7 }
   0xf   :  { %287 = vrot.lane.b32.xlu0 %v286_v39, %s292_s8 }
  0x11   :  { %230 = vmatpush1.bf16.msra.mxu0 %v229_v45  ;;  %270 = vmatpush1.bf16.msra.mxu1 %v229_v45 }
  0x12   :  { %231 = vmatprep.subr.bf16.mxu0 %v291_v3  ;;  %259 = vmatprep.subr.bf16.mxu1 %v291_v3 }
  0x15   :  { %233 = vmatpush1.bf16.msra.mxu0 %v232_v51  ;;  %271 = vmatpush1.bf16.msra.mxu1 %v232_v51 }
  0x16   :  { %234 = vmatprep.subr.bf16.mxu0 %v291_v3  ;;  %260 = vmatprep.subr.bf16.mxu1 %v291_v3 }
  0x19   :  { %236 = vmatpush1.bf16.msra.mxu0 %v235_v54  ;;  %272 = vmatpush1.bf16.msra.mxu1 %v235_v54 }
  0x1a   :  { %237 = vmatprep.subr.bf16.mxu0 %v291_v3  ;;  %261 = vmatprep.subr.bf16.mxu1 %v291_v3 }
  0x1d   :  { %239 = vmatpush1.bf16.msra.mxu0 %v238_v57  ;;  %273 = vmatpush1.bf16.msra.mxu1 %v238_v57 }
  0x1e   :  { %240 = vmatprep.subr.bf16.mxu0 %v291_v3  ;;  %262 = vmatprep.subr.bf16.mxu1 %v291_v3 }
  0x21   :  { %242 = vmatpush1.bf16.msra.mxu0 %v241_v60  ;;  %274 = vmatpush1.bf16.msra.mxu1 %v241_v60 }
  0x22   :  { %243 = vmatprep.subr.bf16.mxu0 %v291_v3  ;;  %263 = vmatprep.subr.bf16.mxu1 %v291_v3 }
  0x25   :  { %245 = vmatpush1.bf16.msra.mxu0 %v244_v63  ;;  %275 = vmatpush1.bf16.msra.mxu1 %v244_v63 }
  0x26   :  { %246 = vmatprep.subr.bf16.mxu0 %v291_v3  ;;  %264 = vmatprep.subr.bf16.mxu1 %v291_v3 }
  0x29   :  { %248 = vmatpush1.bf16.msra.mxu0 %v247_v2  ;;  %276 = vmatpush1.bf16.msra.mxu1 %v247_v2 }
  0x2a   :  { %249 = vmatprep.subr.bf16.mxu0 %v291_v3  ;;  %265 = vmatprep.subr.bf16.mxu1 %v291_v3 }
  0x2d   :  { %251 = vmatpush1.bf16.msra.mxu0 %v250_v6  ;;  %277 = vmatpush1.bf16.msra.mxu1 %v250_v6 }
  0x2e   :  { %252 = vmatprep.subr.bf16.mxu0 %v291_v3  ;;  %266 = vmatprep.subr.bf16.mxu1 %v291_v3 }
  0x31   :  { %254 = vmatpush1.bf16.msra.mxu0 %v253_v9  ;;  %278 = vmatpush1.bf16.msra.mxu1 %v253_v9 }
  0x7d   :  { %v283_v10 = vpop.permute.xlu0 %282 }
  0x7e   :  { %v285_v11 = vunpack.i.h.bf16 %v283_v10  ;;  %v284_v12 = vunpack.i.l.bf16 %v283_v10 }
  0x80   :  { %v78_v13 = vsel %vm77_vm3, %v343_v15, %v284_v12  ;;  %v80_v17 = vsel %vm77_vm3, %v346_v16, %v285_v11  ;;  %v214_v16 = vld [vmem:[%s486_s2] ss:$0 sm:$0xff] }
  0x81   :  { %v288_v19 = vpop.permute.xlu0 %287  ;;  %186 = vmatmul.mubr.f32.vlgmr.msra.gmra.mrb[0].mxu0 %v78_v13  ;;  %196 = vmatmul.mubr.f32.vlgmr.msra.gmra.mrb[0].mxu1 %v80_v17 }
  0x82   :  { %v290_v20 = vunpack.i.h.bf16 %v288_v19  ;;  %v289_v21 = vunpack.i.l.bf16 %v288_v19  ;;  %216 = vmatprep.mubr.msk.f32.mxu0 %vm77_vm3, %v392_v49  ;;  %218 = vmatprep.mubr.msk.f32.mxu1 %vm77_vm3, %v395_v50 }
  0x84   :  { %v79_v3 = vsel %vm77_vm3, %v340_v14, %v289_v21  ;;  %v81_v15 = vsel %vm77_vm3, %v350_v18, %v290_v20 }
  0x85   :  { %191 = vmatmul.mubr.f32.gmra.mrb[2].mxu0 %v79_v3  ;;  %201 = vmatmul.mubr.f32.gmra.mrb[2].mxu1 %v81_v15 }
 0x154   :  { %v187_v22 = vpop.f32.mrb[0].mxu0  ;;  %v197_v23 = vpop.f32.mrb[0].mxu1 }
 0x155   :  { %v188_v24 = vadd.f32 %v214_v16, %v187_v22  ;;  %v198_v25 = vadd.f32 %v214_v16, %v197_v23  ;;  %v189_v26 = vpop.f32.mrb[1].mxu0  ;;  %v199_v27 = vpop.f32.mrb[1].mxu1 }
 0x157   :  { %206 = vst [vmem:[%s487_s3] sm:$0xff] %v188_v24  ;;  %208 = vst [vmem:[%s487_s3 + $0x10] sm:$0xff] %v198_v25 }
 0x158   :  { %v192_v14 = vpop.f32.mrb[2].mxu0  ;;  %v202_v18 = vpop.f32.mrb[2].mxu1 }
 0x159   :  { %v193_v28 = vadd.f32 %v214_v16, %v192_v14  ;;  %v203_v29 = vadd.f32 %v214_v16, %v202_v18  ;;  %v194_v30 = vpop.f32.mrb[3].mxu0  ;;  %v204_v31 = vpop.f32.mrb[3].mxu1 }
 0x15b   :  { %207 = vst [vmem:[%s487_s3 + $0x8] sm:$0xff] %v193_v28  ;;  %209 = vst [vmem:[%s487_s3 + $0x18] sm:$0xff] %v203_v29 }

</bundles_post_ra>
